<compile_context>
chip_gen: v7x
topology: tpu7x:2x2x1
jax: 0.10.0
libtpu: 0.0.40
codegen_flags: <defaults>
</compile_context>

<pallas_src>
import functools

import jax
import jax.numpy as jnp
from jax.experimental import pallas as pl
from jax.experimental.pallas import tpu as pltpu

_LANE = 128
_SUB = 8


def _round_up(n, m):
    return ((n + m - 1) // m) * m


def _mlp_kernel(x_ref, w1_ref, b1_ref, w2_ref, b2_ref, o_ref):
    # x:  [TB, Fp]  f32   (cast to bf16 in-kernel; VPU is free, kernel is mem-bound)
    # w1: [Fp, HP]  bf16   resident
    # b1: [1,  HP]  f32
    # w2: [HP, CP]  bf16   resident
    # b2: [1,  CP]  f32
    # o:  [TB, CP]  f32
    x = x_ref[...].astype(jnp.bfloat16)
    h = jnp.dot(x, w1_ref[...], preferred_element_type=jnp.float32)
    h = jnp.maximum(h + b1_ref[...], 0.0)          # f32 bias + ReLU (v5e-safe)
    o = jnp.dot(h.astype(jnp.bfloat16), w2_ref[...],
                preferred_element_type=jnp.float32)
    o_ref[...] = (o + b2_ref[...]).astype(o_ref.dtype)


def prepare_params(params):
    """One-time padding / bf16 cast of the backbone weights (cache across steps)."""
    w1, b1, w2, b2 = params
    F, H = w1.shape
    C = w2.shape[1]
    Fp = _round_up(F, _LANE)
    HP = _round_up(H, _LANE)
    CP = _round_up(C, _LANE)
    w1p = jnp.zeros((Fp, HP), jnp.bfloat16).at[:F, :H].set(w1.astype(jnp.bfloat16))
    w2p = jnp.zeros((HP, CP), jnp.bfloat16).at[:H, :C].set(w2.astype(jnp.bfloat16))
    b1p = jnp.zeros((1, HP), jnp.float32).at[:, :H].set(b1.reshape(1, H))
    b2p = jnp.zeros((1, CP), jnp.float32).at[:, :C].set(b2.reshape(1, C))
    return (w1p, b1p, w2p, b2p)


@functools.partial(jax.jit, static_argnames=("num_classes", "batch_tile"))
def continual_model_forward(x_nchw, prepared, *, num_classes, batch_tile=1024):
    """forward pass of ContinualModel: returns self.model(x)."""
    w1p, b1p, w2p, b2p = prepared
    Fp, HP = w1p.shape
    CP = w2p.shape[1]

    B = x_nchw.shape[0]
    x2d = x_nchw.reshape(B, -1)                    # glue reshape (no compute)
    F = x2d.shape[1]
    if F != Fp:                                    # F=1024 here -> no-op
        x2d = jnp.pad(x2d, ((0, 0), (0, Fp - F)))

    vmem = pltpu.MemorySpace.VMEM

    if B <= batch_tile:
        # Small-batch path: one full-array block, explicit VMEM placement,
        # no grid machinery, no row/column padding of x at all.
        out = pl.pallas_call(
            _mlp_kernel,
            out_shape=jax.ShapeDtypeStruct((B, CP), jnp.float32),
            in_specs=[pl.BlockSpec(memory_space=vmem)] * 5,
            out_specs=pl.BlockSpec(memory_space=vmem),
        )(x2d, w1p, b1p, w2p, b2p)
    else:
        # Large-batch path: adaptive batch tile so the grid has >= 2 parallel
        # steps (v7x dual TensorCore), weights resident via constant index
        # maps, ragged last tile (no padded copy of x; OOB rows are masked
        # on the output store and sliced never appear in `out`).
        B8 = _round_up(B, _SUB)
        n_tiles = max(2, pl.cdiv(B8, batch_tile))
        TB = _round_up(pl.cdiv(B8, n_tiles), _SUB)
        grid = (pl.cdiv(B, TB),)
        out = pl.pallas_call(
            _mlp_kernel,
            out_shape=jax.ShapeDtypeStruct((B, CP), jnp.float32),
            grid=grid,
            in_specs=[
                pl.BlockSpec((TB, Fp), lambda i: (i, 0)),
                pl.BlockSpec((Fp, HP), lambda i: (0, 0)),
                pl.BlockSpec((1, HP), lambda i: (0, 0)),
                pl.BlockSpec((HP, CP), lambda i: (0, 0)),
                pl.BlockSpec((1, CP), lambda i: (0, 0)),
            ],
            out_specs=pl.BlockSpec((TB, CP), lambda i: (i, 0)),
            compiler_params=pltpu.CompilerParams(
                dimension_semantics=("parallel",),
                vmem_limit_bytes=32 * 1024 * 1024),
        )(x2d, w1p, b1p, w2p, b2p)

    return out[:, :num_classes]


def init_params(key, in_features, hidden, num_classes):
    k1, k2, k3, k4 = jax.random.split(key, 4)
    w1 = jax.random.normal(k1, (in_features, hidden), jnp.float32) * 0.02
    b1 = jax.random.normal(k2, (1, hidden), jnp.float32) * 0.01
    w2 = jax.random.normal(k3, (hidden, num_classes), jnp.float32) * 0.02
    b2 = jax.random.normal(k4, (1, num_classes), jnp.float32) * 0.01
    return (w1, b1, w2, b2)


def _check(out, x, params):
    w1, b1, w2, b2 = params
    x2d = x.reshape(x.shape[0], -1)
    # Matching-precision reference (bf16 MXU inputs, f32 accumulate/bias/ReLU).
    h_ref = jnp.maximum(
        jnp.dot(x2d.astype(jnp.bfloat16), w1.astype(jnp.bfloat16),
                preferred_element_type=jnp.float32) + b1, 0.0)
    ref = jnp.dot(h_ref.astype(jnp.bfloat16), w2.astype(jnp.bfloat16),
                  preferred_element_type=jnp.float32) + b2
    assert jnp.allclose(out, ref, atol=1e-3, rtol=1e-3)
    # Loose check against full-f32 math (semantic fidelity to the torch module;
    # bf16 MXU operands are an intentional inference-grade approximation).
    ref_f32 = jnp.maximum(x2d @ w1 + b1, 0.0) @ w2 + b2
    assert jnp.allclose(out, ref_f32, atol=2e-2, rtol=2e-2)


if __name__ == "__main__":
    key = jax.random.PRNGKey(0)
    kx, kp = jax.random.split(key)

    # Small NCHW input consistent with a conv-style backbone input.
    B, Cin, Hs, Ws = 2, 4, 16, 16
    hidden, num_classes = 32, 10
    x = jax.random.normal(kx, (B, Cin, Hs, Ws), jnp.float32)
    params = init_params(kp, Cin * Hs * Ws, hidden, num_classes)
    prepared = prepare_params(params)           # padded/bf16 weights, cached

    out = continual_model_forward(x, prepared, num_classes=num_classes,
                                  batch_tile=1024)
    jax.block_until_ready(out)
    assert out.shape == (B, num_classes)
    _check(out, x, params)

    # Also exercise the batch-tiled "parallel" grid path (resident weights,
    # adaptive tile, ragged last tile) by forcing a tiny batch_tile.
    xb = jax.random.normal(jax.random.PRNGKey(1), (20, Cin, Hs, Ws), jnp.float32)
    outb = continual_model_forward(xb, prepared, num_classes=num_classes,
                                   batch_tile=8)
    jax.block_until_ready(outb)
    assert outb.shape == (20, num_classes)
    _check(outb, xb, params)

    # ContinualModel.observe() is a training-loop no-op (pass) -- nothing to kernelize.
    print("KERNEL_OK")
</pallas_src>

<mosaic_0001>
module attributes {stable_mosaic.version = 11 : i64} {
  func.func @_mlp_kernel(%arg0: memref<2x1024xf32, #tpu.memory_space<vmem>>, %arg1: memref<1024x128xbf16, #tpu.memory_space<vmem>>, %arg2: memref<1x128xf32, #tpu.memory_space<vmem>>, %arg3: memref<128x128xbf16, #tpu.memory_space<vmem>>, %arg4: memref<1x128xf32, #tpu.memory_space<vmem>>, %arg5: memref<2x128xf32, #tpu.memory_space<vmem>>) attributes {dimension_semantics = [], scalar_prefetch = 0 : i64, scratch_operands = 0 : i64, tpu.core_type = #tpu.core_type<tc>} {
    %c0 = arith.constant 0 : index
    %c0_0 = arith.constant 0 : index
    %0 = vector.load %arg0[%c0, %c0_0] : memref<2x1024xf32, #tpu.memory_space<vmem>>, vector<2x1024xf32>
    %1 = arith.truncf %0 : vector<2x1024xf32> to vector<2x1024xbf16>
    %c0_1 = arith.constant 0 : index
    %c0_2 = arith.constant 0 : index
    %2 = vector.load %arg1[%c0_1, %c0_2] : memref<1024x128xbf16, #tpu.memory_space<vmem>>, vector<1024x128xbf16>
    %cst = arith.constant dense<0.000000e+00> : vector<2x128xf32>
    %3 = tpu.matmul %1, %2, %cst {dimension_numbers = #tpu.dot_dimension_numbers<[1], [0], [0], [1], [0, 0, 1, 1], [], []>} : vector<2x1024xbf16>, vector<1024x128xbf16>, vector<2x128xf32> -> vector<2x128xf32>
    %c0_3 = arith.constant 0 : index
    %c0_4 = arith.constant 0 : index
    %4 = vector.load %arg2[%c0_3, %c0_4] : memref<1x128xf32, #tpu.memory_space<vmem>>, vector<1x128xf32>
    %5 = vector.broadcast %4 : vector<1x128xf32> to vector<2x128xf32>
    %6 = arith.addf %3, %5 : vector<2x128xf32>
    %cst_5 = arith.constant 0.000000e+00 : f32
    %7 = vector.broadcast %cst_5 : f32 to vector<2x128xf32>
    %8 = arith.maximumf %6, %7 : vector<2x128xf32>
    %9 = arith.truncf %8 : vector<2x128xf32> to vector<2x128xbf16>
    %c0_6 = arith.constant 0 : index
    %c0_7 = arith.constant 0 : index
    %10 = vector.load %arg3[%c0_6, %c0_7] : memref<128x128xbf16, #tpu.memory_space<vmem>>, vector<128x128xbf16>
    %cst_8 = arith.constant dense<0.000000e+00> : vector<2x128xf32>
    %11 = tpu.matmul %9, %10, %cst_8 {dimension_numbers = #tpu.dot_dimension_numbers<[1], [0], [0], [1], [0, 0, 1, 1], [], []>} : vector<2x128xbf16>, vector<128x128xbf16>, vector<2x128xf32> -> vector<2x128xf32>
    %c0_9 = arith.constant 0 : index
    %c0_10 = arith.constant 0 : index
    %12 = vector.load %arg4[%c0_9, %c0_10] : memref<1x128xf32, #tpu.memory_space<vmem>>, vector<1x128xf32>
    %13 = vector.broadcast %12 : vector<1x128xf32> to vector<2x128xf32>
    %14 = arith.addf %11, %13 : vector<2x128xf32>
    %c0_11 = arith.constant 0 : index
    %c0_12 = arith.constant 0 : index
    %15 = vector.load %arg5[%c0_11, %c0_12] : memref<2x128xf32, #tpu.memory_space<vmem>>, vector<2x128xf32>
    tpu.vector_store %arg5[%c0_11, %c0_12], %14 {strides = array<i32>} : memref<2x128xf32, #tpu.memory_space<vmem>>, vector<2x128xf32>,
    return
  }
}

</mosaic_0001>

<bundles_post_ra>
// kernel: continual_model_forward.1
= control target key start
LH: loop header
LB: loop body
LE: loop exit
PB: predicated region body
PF: predicated region fallthrough
CT: control target
= control target key end

     0   :  { %10 = vsyncpa [#allocation3], 0  ;;  %s1321_s0 = inlined_call_operand.vmem [shape: f32[2,1024], index: 0, kind: input, shape index: {}]   ;;  %s1322_s1 = inlined_call_operand.hbm [shape: bf16[1024,128], index: 1, kind: input, shape index: {}]   ;;  %s1323_s2 = inlined_call_operand.vmem [shape: f32[1,128], index: 2, kind: input, shape index: {}]   ;;  %s1324_s3 = inlined_call_operand.vmem [shape: bf16[128,128], index: 3, kind: input, shape index: {}]   ;;  %s1325_s4 = inlined_call_operand.vmem [shape: f32[1,128], index: 4, kind: input, shape index: {}]   ;;  %s1326_s5 = inlined_call_operand.hbm [shape: f32[2,128], index: 5, kind: output, shape index: {}]  }
   0x1   :  { %11 = vsyncpa [#allocation4], 0  ;;  %s1218_s18 = smov [#allocation2]   ;;  %s1170_s22 = scalar_lea.hbm %s1322_s1, 8192 }
   0x2   :  { %s19_s19 = sshll.u32 %s1218_s18, 4  ;;  %p1171_p0 = scmp.ne.s32.totalorder %s1322_s1, %s1170_s22  ;;  %s20_s19 = int_to_ptr.vmem [resolvable:$true] %s19_s19 }
   0x3   :  { %p1174_p1 = scmp.lt.u32.totalorder %s1170_s22, %s1322_s1 }
   0x5   :  { %p1176_p2 = pnand %p1174_p1, %p1171_p0 }
   0x7   :  { %1179 = shalt.err (!%p1176_p2)
}
   0x8   :  { %s1180_s27 = scalar_lea.vmem %s20_s19, 8192  ;;  %p1185_p4 = scmp.lt.s32.totalorder %s20_s19, %s20_s19 }
   0x9   :  { %p1181_p3 = scmp.ne.s32.totalorder %s20_s19, %s1180_s27  ;;  %p1186_p5 = scmp.lt.s32.totalorder %s1180_s27, %s1180_s27 }
   0xb   :  { %p1187_p6 = por %p1186_p5, %p1185_p4 }
   0xd   :  { %p1188_p7 = pnand %p1187_p6, %p1181_p3 }
   0xf   :  { %1191 = shalt.err (!%p1188_p7)
}
  0x10   :  { %s1219_s28 = smov 64   ;;  %s1220_s29 = smov 4  }
  0x11   :  { %25 = dma.hbm_to_vmem [thread:$0]  %s1322_s1, 8192, %s20_s19, [#allocation3], %s1219_s28, %s1219_s28, %s1220_s29  }
  0x12   :  { %1214 = dma.done.wait [#allocation3], 8192  }
  0x13   :  { %1215 = vsyncadd [#allocation3], 4294959104  ;;  %v1096_v0 = vld [vmem:[#allocation2 + $0x40] sm:$0xff]   ;;  %v1100_v4 = vld [vmem:[#allocation2 + $0x48] sm:$0xff]   ;;  %v1221_v22 = vmov 1983009808   ;;  %v44_v24 = vlaneseq }
  0x14   :  { %v1097_v1 = vld [vmem:[#allocation2 + $0xc0] sm:$0xff]   ;;  %972 = vmatprep.subr.bf16.mxu0 %v1096_v0  ;;  %v1101_v5 = vld [vmem:[#allocation2 + $0xc8] sm:$0xff]   ;;  %v1104_v8 = vld [vmem:[#allocation2 + $0x50] sm:$0xff]   ;;  %v42_v23 = vunpack.c.l.s4 %v1221_v22  ;;  %vm1223_vm0 = vmmov 0   ;;  %s1224_s27 = smov [#allocation5]  }
  0x15   :  { %v1098_v2 = vld [vmem:[#allocation2] sm:$0xff]   ;;  %994 = vmatprep.subr.bf16.mxu1 %v1097_v1  ;;  %v1102_v6 = vld [vmem:[#allocation2 + $0x8] sm:$0xff]   ;;  %v1105_v9 = vld [vmem:[#allocation2 + $0xd0] sm:$0xff]   ;;  %v45_v30 = vshrl.u32 %v44_v24, 7  ;;  %s889_s28 = sshll.u32 %s1224_s27, 4  ;;  %s890_s28 = int_to_ptr.vmem [resolvable:$true] %s889_s28 }
  0x16   :  { %v1099_v3 = vld [vmem:[#allocation2 + $0x80] sm:$0xff]   ;;  %973 = vmatpush3.bf16.msra.mxu0 %v1098_v2  ;;  %v1103_v7 = vld [vmem:[#allocation2 + $0x88] sm:$0xff]   ;;  %v1106_v10 = vld [vmem:[#allocation2 + $0x10] sm:$0xff]   ;;  %v43_v29 = vunpack.c.0.s8 %v42_v23  ;;  %s1192_s29 = scalar_lea.vmem %s890_s28, 32  ;;  %p1197_p9 = scmp.lt.s32.totalorder %s890_s28, %s890_s28 }
  0x17   :  { %995 = vmatpush3.bf16.msra.mxu1 %v1099_v3  ;;  %974 = vmatprep.subr.bf16.mxu0 %v1100_v4  ;;  %v1107_v11 = vld [vmem:[#allocation2 + $0x90] sm:$0xff]   ;;  %v1108_v12 = vld [vmem:[#allocation2 + $0x58] sm:$0xff]   ;;  %v1112_v16 = vld [vmem:[#allocation2 + $0x60] sm:$0xff]   ;;  %p1193_p8 = scmp.ne.s32.totalorder %s890_s28, %s1192_s29  ;;  %p1198_p10 = scmp.lt.s32.totalorder %s1192_s29, %s1192_s29 }
  0x18   :  { %996 = vmatprep.subr.bf16.mxu1 %v1101_v5  ;;  %v1109_v13 = vld [vmem:[#allocation2 + $0xd8] sm:$0xff]   ;;  %v1113_v17 = vld [vmem:[#allocation2 + $0xe0] sm:$0xff]   ;;  %v1116_v20 = vld [vmem:[#allocation2 + $0x68] sm:$0xff]   ;;  %v1267_v35 = vsub.s32 %v43_v29, %v45_v30 }
  0x19   :  { %v1110_v14 = vld [vmem:[#allocation2 + $0x18] sm:$0xff]   ;;  %v1114_v18 = vld [vmem:[#allocation2 + $0x20] sm:$0xff]   ;;  %v1117_v21 = vld [vmem:[#allocation2 + $0xe8] sm:$0xff]   ;;  %p1199_p11 = por %p1198_p10, %p1197_p9 }
  0x1a   :  { %975 = vmatpush3.bf16.msra.mxu0 %v1102_v6  ;;  %v1111_v15 = vld [vmem:[#allocation2 + $0x98] sm:$0xff]   ;;  %v1115_v19 = vld [vmem:[#allocation2 + $0xa0] sm:$0xff]   ;;  %v1118_v25 = vld [vmem:[#allocation2 + $0x28] sm:$0xff]  }
  0x1b   :  { %997 = vmatpush3.bf16.msra.mxu1 %v1103_v7  ;;  %976 = vmatprep.subr.bf16.mxu0 %v1104_v8  ;;  %v1119_v26 = vld [vmem:[#allocation2 + $0xa8] sm:$0xff]   ;;  %v1120_v27 = vld [vmem:[#allocation2 + $0x70] sm:$0xff]   ;;  %v1124_v33 = vld [vmem:[#allocation2 + $0x78] sm:$0xff]   ;;  %p1200_p12 = pnand %p1199_p11, %p1193_p8 }
  0x1c   :  { %998 = vmatprep.subr.bf16.mxu1 %v1105_v9  ;;  %v1121_v28 = vld [vmem:[#allocation2 + $0xf0] sm:$0xff]   ;;  %v1125_v34 = vld [vmem:[#allocation2 + $0xf8] sm:$0xff]   ;;  %v36_v38 = vld [vmem:[%s1321_s0] sm:$0xff] }
  0x1d   :  { %v1122_v31 = vld [vmem:[#allocation2 + $0x30] sm:$0xff]   ;;  %v1126_v36 = vld [vmem:[#allocation2 + $0x38] sm:$0xff]   ;;  %v47_v39 = vrot.slane %v36_v38, %v1267_v35  ;;  %v40_v40 = vcombine.high %v36_v38, %v36_v38  ;;  %v1129_v41 = vld [vmem:[#allocation2 + $0x140] sm:$0xff]  }
  0x1e   :  { %977 = vmatpush3.bf16.msra.mxu0 %v1106_v10  ;;  %v1123_v32 = vld [vmem:[#allocation2 + $0xb0] sm:$0xff]   ;;  %v1127_v37 = vld [vmem:[#allocation2 + $0xb8] sm:$0xff]   ;;  %v1130_v42 = vld [vmem:[#allocation2 + $0x1c0] sm:$0xff]  }
  0x1f   :  { %999 = vmatpush3.bf16.msra.mxu1 %v1107_v11  ;;  %978 = vmatprep.subr.bf16.mxu0 %v1108_v12  ;;  %v55_v43 = vcombine.high %v47_v39, %v47_v39  ;;  %v54_v44 = vrot.slane %v40_v40, %v1267_v35  ;;  %v82_v45 = vpack.c.bf16 %v47_v39, %v47_v39  ;;  %v1131_v46 = vld [vmem:[#allocation2 + $0x100] sm:$0xff]   ;;  %v1133_v51 = vld [vmem:[#allocation2 + $0x148] sm:$0xff]   ;;  %v1137_v56 = vld [vmem:[#allocation2 + $0x150] sm:$0xff]  }
  0x20   :  { %1000 = vmatprep.subr.bf16.mxu1 %v1109_v13  ;;  %v1132_v49 = vld [vmem:[#allocation2 + $0x180] sm:$0xff]   ;;  %v1134_v53 = vld [vmem:[#allocation2 + $0x1c8] sm:$0xff]   ;;  %v1138_v57 = vld [vmem:[#allocation2 + $0x1d0] sm:$0xff]  }
  0x21   :  { %v83_v47 = vpack.c.bf16 %v55_v43, %v55_v43  ;;  %v56_v48 = vcombine.high %v54_v44, %v54_v44  ;;  %v84_v50 = vpack.c.bf16 %v54_v44, %v54_v44  ;;  %v1135_v54 = vld [vmem:[#allocation2 + $0x108] sm:$0xff]   ;;  %v1139_v58 = vld [vmem:[#allocation2 + $0x110] sm:$0xff]   ;;  %v1141_v60 = vld [vmem:[#allocation2 + $0x158] sm:$0xff]  }
  0x22   :  { %979 = vmatpush3.bf16.msra.mxu0 %v1110_v14  ;;  %v1136_v55 = vld [vmem:[#allocation2 + $0x188] sm:$0xff]   ;;  %v1140_v59 = vld [vmem:[#allocation2 + $0x190] sm:$0xff]   ;;  %v1142_v61 = vld [vmem:[#allocation2 + $0x1d8] sm:$0xff]  }
  0x23   :  { %1001 = vmatpush3.bf16.msra.mxu1 %v1111_v15  ;;  %980 = vmatprep.subr.bf16.mxu0 %v1112_v16  ;;  %v85_v52 = vpack.c.bf16 %v56_v48, %v56_v48  ;;  %v1143_v62 = vld [vmem:[#allocation2 + $0x118] sm:$0xff]   ;;  %v1145_v0 = vld [vmem:[#allocation2 + $0x160] sm:$0xff]   ;;  %v1149_v4 = vld [vmem:[#allocation2 + $0x168] sm:$0xff]  }
  0x24   :  { %1002 = vmatprep.subr.bf16.mxu1 %v1113_v17  ;;  %641 = vmatprep.mubr.bf16.mxu0 %v83_v47  ;;  %v1144_v63 = vld [vmem:[#allocation2 + $0x198] sm:$0xff]   ;;  %v1146_v1 = vld [vmem:[#allocation2 + $0x1e0] sm:$0xff]   ;;  %v1150_v5 = vld [vmem:[#allocation2 + $0x1e8] sm:$0xff]  }
  0x25   :  { %681 = vmatprep.mubr.bf16.mxu1 %v85_v52  ;;  %v1147_v2 = vld [vmem:[#allocation2 + $0x120] sm:$0xff]   ;;  %v1151_v6 = vld [vmem:[#allocation2 + $0x128] sm:$0xff]   ;;  %v1153_v8 = vld [vmem:[#allocation2 + $0x170] sm:$0xff]  }
  0x26   :  { %981 = vmatpush3.bf16.msra.mxu0 %v1114_v18  ;;  %v1148_v3 = vld [vmem:[#allocation2 + $0x1a0] sm:$0xff]   ;;  %v1152_v7 = vld [vmem:[#allocation2 + $0x1a8] sm:$0xff]   ;;  %v1154_v9 = vld [vmem:[#allocation2 + $0x1f0] sm:$0xff]  }
  0x27   :  { %1003 = vmatpush3.bf16.msra.mxu1 %v1115_v19  ;;  %982 = vmatprep.subr.bf16.mxu0 %v1116_v20  ;;  %v1155_v10 = vld [vmem:[#allocation2 + $0x130] sm:$0xff]   ;;  %v1157_v12 = vld [vmem:[#allocation2 + $0x178] sm:$0xff]   ;;  %v37_v15 = vld [vmem:[%s1321_s0 + $0x8] sm:$0xff] }
  0x28   :  { %1004 = vmatprep.subr.bf16.mxu1 %v1117_v21  ;;  %v1156_v11 = vld [vmem:[#allocation2 + $0x1b0] sm:$0xff]   ;;  %v1158_v13 = vld [vmem:[#allocation2 + $0x1f8] sm:$0xff]   ;;  %v64_v17 = vrot.slane %v37_v15, %v1267_v35  ;;  %v57_v18 = vcombine.high %v37_v15, %v37_v15 }
  0x29   :  { %v1159_v14 = vld [vmem:[#allocation2 + $0x138] sm:$0xff]   ;;  %v1164_v29 = vld [vmem:[%s1324_s3 + $0x10] sm:$0xff]  }
  0x2a   :  { %983 = vmatpush3.bf16.msra.mxu0 %v1118_v25  ;;  %v1160_v16 = vld [vmem:[#allocation2 + $0x1b8] sm:$0xff]   ;;  %v72_v19 = vcombine.high %v64_v17, %v64_v17  ;;  %v71_v20 = vrot.slane %v57_v18, %v1267_v35  ;;  %v86_v21 = vpack.c.bf16 %v64_v17, %v64_v17 }
  0x2b   :  { %1005 = vmatpush3.bf16.msra.mxu1 %v1119_v26  ;;  %984 = vmatprep.subr.bf16.mxu0 %v1120_v27  ;;  %v1162_v26 = vld [vmem:[%s1324_s3] sm:$0xff]   ;;  %v1222_v27 = vmov 0.0   ;;  %v1165_v30 = vld [vmem:[%s1324_s3 + $0x18] sm:$0xff]  }
  0x2c   :  { %1006 = vmatprep.subr.bf16.mxu1 %v1121_v28  ;;  %v87_v22 = vpack.c.bf16 %v72_v19, %v72_v19  ;;  %v73_v23 = vcombine.high %v71_v20, %v71_v20  ;;  %v88_v24 = vpack.c.bf16 %v71_v20, %v71_v20  ;;  %v1163_v28 = vld [vmem:[%s1324_s3 + $0x8] sm:$0xff]  }
  0x2e   :  { %985 = vmatpush3.bf16.msra.mxu0 %v1122_v31  ;;  %v89_v25 = vpack.c.bf16 %v73_v23, %v73_v23  ;;  %v1166_v31 = vld [vmem:[%s1324_s3 + $0x20] sm:$0xff]  }
  0x2f   :  { %1007 = vmatpush3.bf16.msra.mxu1 %v1123_v32  ;;  %986 = vmatprep.subr.bf16.mxu0 %v1124_v33  ;;  %v1167_v32 = vld [vmem:[%s1324_s3 + $0x28] sm:$0xff]   ;;  %v1168_v33 = vld [vmem:[%s1324_s3 + $0x30] sm:$0xff]  }
  0x30   :  { %1008 = vmatprep.subr.bf16.mxu1 %v1125_v34  ;;  %v1169_v34 = vld [vmem:[%s1324_s3 + $0x38] sm:$0xff]  }
  0x32   :  { %987 = vmatpush3.bf16.msra.mxu0 %v1126_v36  ;;  %v898_v36 = vld [vmem:[%s1323_s2] ss:$0 sm:$0xff] }
  0x33   :  { %1009 = vmatpush3.bf16.msra.mxu1 %v1127_v37  ;;  %1016 = vmatprep.subr.bf16.mxu0 %v1129_v41 }
  0x34   :  { %1038 = vmatprep.subr.bf16.mxu1 %v1130_v42 }
  0x35   :  { %642 = vmatmul.mubr.bf16.vlgmr.msra.gmra.mrb[0].mxu0 %v82_v45 }
  0x36   :  { %1017 = vmatpush3.bf16.msra.mxu0 %v1131_v46  ;;  %682 = vmatmul.mubr.bf16.vlgmr.msra.gmra.mrb[0].mxu1 %v84_v50 }
  0x37   :  { %1018 = vmatprep.subr.bf16.mxu0 %v1133_v51  ;;  %1039 = vmatpush3.bf16.msra.mxu1 %v1132_v49 }
  0x38   :  { %1040 = vmatprep.subr.bf16.mxu1 %v1134_v53  ;;  %721 = vmatprep.mubr.bf16.mxu0 %v87_v22 }
  0x39   :  { %761 = vmatprep.mubr.bf16.mxu1 %v89_v25 }
  0x3a   :  { %1019 = vmatpush3.bf16.msra.mxu0 %v1135_v54 }
  0x3b   :  { %1020 = vmatprep.subr.bf16.mxu0 %v1137_v56  ;;  %1041 = vmatpush3.bf16.msra.mxu1 %v1136_v55 }
  0x3c   :  { %1042 = vmatprep.subr.bf16.mxu1 %v1138_v57 }
  0x3e   :  { %1021 = vmatpush3.bf16.msra.mxu0 %v1139_v58 }
  0x3f   :  { %1022 = vmatprep.subr.bf16.mxu0 %v1141_v60  ;;  %1043 = vmatpush3.bf16.msra.mxu1 %v1140_v59 }
  0x40   :  { %1044 = vmatprep.subr.bf16.mxu1 %v1142_v61 }
  0x42   :  { %1023 = vmatpush3.bf16.msra.mxu0 %v1143_v62  ;;  %v963_v62 = vld [vmem:[%s1325_s4] ss:$0 sm:$0xff] }
  0x43   :  { %1024 = vmatprep.subr.bf16.mxu0 %v1145_v0  ;;  %1045 = vmatpush3.bf16.msra.mxu1 %v1144_v63 }
  0x44   :  { %1046 = vmatprep.subr.bf16.mxu1 %v1146_v1 }
  0x46   :  { %1025 = vmatpush3.bf16.msra.mxu0 %v1147_v2 }
  0x47   :  { %1026 = vmatprep.subr.bf16.mxu0 %v1149_v4  ;;  %1047 = vmatpush3.bf16.msra.mxu1 %v1148_v3 }
  0x48   :  { %1048 = vmatprep.subr.bf16.mxu1 %v1150_v5 }
  0x4a   :  { %1027 = vmatpush3.bf16.msra.mxu0 %v1151_v6 }
  0x4b   :  { %1028 = vmatprep.subr.bf16.mxu0 %v1153_v8  ;;  %1049 = vmatpush3.bf16.msra.mxu1 %v1152_v7 }
  0x4c   :  { %1050 = vmatprep.subr.bf16.mxu1 %v1154_v9 }
  0x4e   :  { %1029 = vmatpush3.bf16.msra.mxu0 %v1155_v10 }
  0x4f   :  { %1030 = vmatprep.subr.bf16.mxu0 %v1157_v12  ;;  %1051 = vmatpush3.bf16.msra.mxu1 %v1156_v11 }
  0x50   :  { %1052 = vmatprep.subr.bf16.mxu1 %v1158_v13 }
  0x52   :  { %1031 = vmatpush3.bf16.msra.mxu0 %v1159_v14 }
  0x53   :  { %1053 = vmatpush3.bf16.msra.mxu1 %v1160_v16  ;;  %1069 = vmatprep.subr.bf16.mxu0 %v1222_v27 }
  0x55   :  { %722 = vmatmul.mubr.bf16.vlgmr.msra.gmra.mrb[4].mxu0 %v86_v21 }
  0x56   :  { %762 = vmatmul.mubr.bf16.vlgmr.msra.gmra.mrb[4].mxu1 %v88_v24  ;;  %1070 = vmatpush3.bf16.msra.mxu0 %v1162_v26 }
  0x57   :  { %1071 = vmatprep.subr.bf16.mxu0 %v1222_v27  ;;  %1085 = vmatprep.mubr.msk.bf16.mxu0 %vm1223_vm0, %v1222_v27 }
  0x5a   :  { %1072 = vmatpush3.bf16.msra.mxu0 %v1163_v28 }
  0x5b   :  { %1073 = vmatprep.subr.bf16.mxu0 %v1222_v27 }
  0x5e   :  { %1074 = vmatpush3.bf16.msra.mxu0 %v1164_v29 }
  0x5f   :  { %1075 = vmatprep.subr.bf16.mxu0 %v1222_v27 }
  0x62   :  { %1076 = vmatpush3.bf16.msra.mxu0 %v1165_v30 }
  0x63   :  { %1077 = vmatprep.subr.bf16.mxu0 %v1222_v27 }
  0x66   :  { %1078 = vmatpush3.bf16.msra.mxu0 %v1166_v31 }
  0x67   :  { %1079 = vmatprep.subr.bf16.mxu0 %v1222_v27 }
  0x6a   :  { %1080 = vmatpush3.bf16.msra.mxu0 %v1167_v32 }
  0x6b   :  { %1081 = vmatprep.subr.bf16.mxu0 %v1222_v27 }
  0x6e   :  { %1082 = vmatpush3.bf16.msra.mxu0 %v1168_v33 }
  0x6f   :  { %1083 = vmatprep.subr.bf16.mxu0 %v1222_v27 }
  0x72   :  { %1084 = vmatpush3.bf16.msra.mxu0 %v1169_v34 }
 0x108   :  { %v988_v35 = vpop.f32.mrb[0].mxu0 }
 0x109   :  { %v989_v37 = vpop.f32.mrb[1].mxu0  ;;  %v1010_v38 = vpop.f32.mrb[0].mxu1 }
 0x10a   :  { %v990_v39 = vadd.f32 %v989_v37, %v988_v35  ;;  %v991_v40 = vpop.f32.mrb[2].mxu0  ;;  %v1011_v41 = vpop.f32.mrb[1].mxu1 }
 0x10b   :  { %v992_v42 = vpop.f32.mrb[3].mxu0  ;;  %v1012_v44 = vadd.f32 %v1011_v41, %v1010_v38  ;;  %v1013_v45 = vpop.f32.mrb[2].mxu1 }
 0x10c   :  { %v644_v43 = vadd.f32 %v990_v39, %v898_v36  ;;  %v1014_v46 = vpop.f32.mrb[3].mxu1 }
 0x10e   :  { %v684_v47 = vadd.f32 %v1012_v44, %v644_v43 }
 0x128   :  { %v1032_v48 = vpop.f32.mrb[4].mxu0 }
 0x129   :  { %v1033_v49 = vpop.f32.mrb[5].mxu0  ;;  %v1054_v50 = vpop.f32.mrb[4].mxu1 }
 0x12a   :  { %v1034_v51 = vadd.f32 %v1033_v49, %v1032_v48  ;;  %v1035_v52 = vpop.f32.mrb[6].mxu0  ;;  %v1055_v53 = vpop.f32.mrb[5].mxu1 }
 0x12b   :  { %v1036_v54 = vpop.f32.mrb[7].mxu0  ;;  %v1056_v56 = vadd.f32 %v1055_v53, %v1054_v50  ;;  %v1057_v57 = vpop.f32.mrb[6].mxu1 }
 0x12c   :  { %v724_v55 = vadd.f32 %v1034_v51, %v684_v47  ;;  %v1058_v58 = vpop.f32.mrb[7].mxu1 }
 0x12e   :  { %v764_v59 = vadd.f32 %v1056_v56, %v724_v55 }
 0x130   :  { %v769_v60 = vmax.f32 %v764_v59, 0.0 }
 0x132   :  { %v770_v61 = vpack.c.bf16 %v769_v60, %v769_v60 }
 0x134   :  { %1086 = vmatmul.mubr.bf16.vlgmr.msra.gmra.mrb[8].mxu0 %v770_v61 }
 0x207   :  { %v876_v63 = vpop.f32.mrb[8].mxu0 }
 0x208   :  { %v877_v0 = vadd.f32 %v963_v62, %v876_v63  ;;  %v1087_v1 = vpop.f32.mrb[9].mxu0 }
 0x209   :  { %v879_v2 = vpop.f32.mrb[10].mxu0 }
 0x20a   :  { %882 = vst [vmem:[#allocation5] sm:$0x3] %v877_v0  ;;  %v1088_v3 = vpop.f32.mrb[11].mxu0 }
 0x20b   :  { %1203 = shalt.err (!%p1200_p12)
}
 0x20c   :  { %s1204_s4 = scalar_lea.hbm %s1326_s5, 32 }
 0x20d   :  { %p1205_p13 = scmp.ne.s32.totalorder %s1326_s5, %s1204_s4  ;;  %p1208_p0 = scmp.lt.u32.totalorder %s1204_s4, %s1326_s5 }
 0x20f   :  { %p1210_p1 = pnand %p1208_p0, %p1205_p13 }
 0x211   :  { %1213 = shalt.err (!%p1210_p1)
}
 0x212   :  { %892 = dma.vmem_to_hbm [thread:$0]  %s890_s28, 32, %s1326_s5, [#allocation4]  }
 0x213   :  { %1216 = dma.done.wait [#allocation4], 32  }
 0x214   :  { %1217 = vsyncadd [#allocation4], 4294967264 }
 0x215   :  { %896 = vsyncpa [#allocation3], 1 }
 0x216   :  { %897 = vsyncpa [#allocation4], 1 }

</bundles_post_ra>
